<compile_context>
chip_gen: v6e
topology: v6e:2x2x1
jax: 0.10.0
libtpu: 0.0.40
codegen_flags: <defaults>
</compile_context>

<pallas_src>
import functools

import jax
import jax.numpy as jnp
from jax.experimental import pallas as pl
from jax.experimental.pallas import tpu as pltpu

EPS = 1e-3
LANES = 128                       # TPU lane width (last dim)
ACC_ROWS_MAX = 64                 # accumulator rows -> 8 independent add chains
TILE_BYTES = 2 * 1024 * 1024      # ~2 MiB per input block, in the INPUT dtype
VMEM_LIMIT = 32 * 1024 * 1024     # 2 inputs x 2 bufs x 2 MiB + f32 temps << 32 MiB


def _round_up(n, m):
    return (n + m - 1) // m * m


def _charbonnier_kernel(x_ref, y_ref, o_ref, *,
                        n_rows, tile_rows, acc_rows, n_blocks, blocks_per_core):
    c = pl.program_id(0)            # TensorCore-split axis ("parallel")
    i = pl.program_id(1)            # reduction axis ("arbitrary")

    @pl.when(i == 0)
    def _():
        o_ref[...] = jnp.zeros_like(o_ref)

    # Block index this step processes (index_map clamps identically).
    blk_raw = c * blocks_per_core + i
    blk = jnp.minimum(blk_raw, n_blocks - 1)

    # Common work (always needed): upcast, diff, square, +eps^2, sqrt.
    diff = x_ref[...].astype(jnp.float32) - y_ref[...].astype(jnp.float32)
    err = jnp.sqrt(diff * diff + jnp.float32(EPS * EPS))

    # Only the block holding the partial tail rows (or a clamped duplicate
    # block on the last core) ever needs masking.
    rows_before = blk * tile_rows
    needs_mask = (rows_before + tile_rows > n_rows) | (blk_raw >= n_blocks)

    @pl.when(jnp.logical_not(needs_mask))
    def _():
        # Pure-VPU reduce: tile_rows//acc_rows summands per vreg position ->
        # 8 independent dependency chains, fully hidden under the block DMA.
        o_ref[0] += err.reshape(tile_rows // acc_rows, acc_rows, LANES).sum(axis=0)

    @pl.when(needs_mask)
    def _():
        # Row-only mask (no 32-bit flat element index -> no overflow risk and
        # fewer VALU ops).  Garbage rows of the Pallas-padded partial block may
        # contain NaN/Inf after sqrt; the select drops them exactly to 0.
        row = jax.lax.broadcasted_iota(jnp.int32, (tile_rows, LANES), 0)
        valid = ((rows_before + row) < n_rows) & (blk_raw < n_blocks)
        masked = jnp.where(valid, err, jnp.float32(0.0))
        o_ref[0] += masked.reshape(tile_rows // acc_rows, acc_rows, LANES).sum(axis=0)


@jax.jit
def charbonnier_loss(x, y):
    assert x.shape == y.shape
    n_elem = x.size
    assert n_elem > 0

    # TPU has no 64-bit vector path; the loss math is f32 anyway.
    if jnp.dtype(x.dtype).itemsize > 4:
        x = x.astype(jnp.float32)
    if jnp.dtype(y.dtype).itemsize > 4:
        y = y.astype(jnp.float32)

    xf = x.reshape(-1)
    yf = y.reshape(-1)

    # Lane-aligned body goes through the kernel; the (<128-element) tail is
    # summed with plain jnp.  No full-array pad -> no extra HBM pass for
    # aligned shapes (the common case for image tensors).
    n_body = (n_elem // LANES) * LANES
    tail = n_elem - n_body
    if tail:
        dt = xf[n_body:].astype(jnp.float32) - yf[n_body:].astype(jnp.float32)
        tail_sum = jnp.sum(jnp.sqrt(dt * dt + jnp.float32(EPS * EPS)))
    else:
        tail_sum = jnp.float32(0.0)

    if n_body == 0:
        return tail_sum / jnp.float32(n_elem)

    x2d = xf[:n_body].reshape(-1, LANES)
    y2d = yf[:n_body].reshape(-1, LANES)
    n_rows = x2d.shape[0]

    # Dtype-aware tiling: sublane multiple from the narrowest input dtype
    # (8 f32 / 16 bf16 / 32 int8) and a byte-targeted block size so every
    # dtype sees the same DMA time per grid step.
    x_item = jnp.dtype(x2d.dtype).itemsize
    y_item = jnp.dtype(y2d.dtype).itemsize
    sub_mult = 8 * max(1, 4 // min(x_item, y_item))
    acc_rows = min(ACC_ROWS_MAX, _round_up(n_rows, sub_mult))
    rows_target = max(acc_rows, TILE_BYTES // (LANES * max(x_item, y_item)))
    tile_rows = min(rows_target, _round_up(n_rows, acc_rows))   # multiple of acc_rows

    n_blocks = (n_rows + tile_rows - 1) // tile_rows
    num_cores = 2 if n_blocks >= 2 else 1        # megacore split only when useful
    blocks_per_core = (n_blocks + num_cores - 1) // num_cores

    def in_map(c, i):
        # Clamp so the block index always stays in range; the duplicated block
        # (only when n_blocks is odd) is fully masked in-kernel.
        return (jnp.minimum(c * blocks_per_core + i, n_blocks - 1), 0)

    kernel = functools.partial(
        _charbonnier_kernel,
        n_rows=n_rows, tile_rows=tile_rows, acc_rows=acc_rows,
        n_blocks=n_blocks, blocks_per_core=blocks_per_core)

    partials = pl.pallas_call(
        kernel,
        out_shape=jax.ShapeDtypeStruct((num_cores, acc_rows, LANES), jnp.float32),
        grid_spec=pltpu.PrefetchScalarGridSpec(
            num_scalar_prefetch=0,
            grid=(num_cores, blocks_per_core),
            in_specs=[
                pl.BlockSpec((tile_rows, LANES), in_map),
                pl.BlockSpec((tile_rows, LANES), in_map),
            ],
            out_specs=pl.BlockSpec((1, acc_rows, LANES), lambda c, i: (c, 0, 0)),
        ),
        compiler_params=pltpu.CompilerParams(
            dimension_semantics=("parallel", "arbitrary"),
            vmem_limit_bytes=VMEM_LIMIT),
        cost_estimate=pl.CostEstimate(
            flops=3 * n_body,
            transcendentals=n_body,
            bytes_accessed=n_body * (x_item + y_item)
                           + num_cores * acc_rows * LANES * 4),
    )(x2d, y2d)

    # Single cheap cross-lane reduce over the tiny partial-sum slab, then mean.
    return (jnp.sum(partials) + tail_sum) / jnp.float32(n_elem)


def charbonnier_loss_ref(x, y):
    diff = x.astype(jnp.float32) - y.astype(jnp.float32)
    return jnp.mean(jnp.sqrt(diff * diff + EPS * EPS))


if __name__ == "__main__":
    key = jax.random.PRNGKey(0)
    kx, ky = jax.random.split(key)

    # Lane-aligned case (fast path, no masking).
    shape = (2, 4, 16, 16)   # NCHW, matches PyTorch convention
    x = jax.random.normal(kx, shape, dtype=jnp.float32)
    y = jax.random.normal(ky, shape, dtype=jnp.float32)
    loss = charbonnier_loss(x, y)
    jax.block_until_ready(loss)
    ref = charbonnier_loss_ref(x, y)
    assert jnp.allclose(loss, ref, rtol=1e-5, atol=1e-6), (loss, ref)

    # Misaligned case (exercises the in-kernel row mask + wrapper tail path).
    shape2 = (3, 3, 17, 17)
    x2 = jax.random.normal(kx, shape2, dtype=jnp.float32)
    y2 = jax.random.normal(ky, shape2, dtype=jnp.float32)
    loss2 = charbonnier_loss(x2, y2)
    jax.block_until_ready(loss2)
    ref2 = charbonnier_loss_ref(x2, y2)
    assert jnp.allclose(loss2, ref2, rtol=1e-5, atol=1e-6), (loss2, ref2)

    print("KERNEL_OK")
</pallas_src>

<mosaic_0001>
module attributes {stable_mosaic.version = 11 : i64} {
  func.func @_charbonnier_kernel(%arg0: i32, %arg1: i32, %arg2: memref<16x128xf32, #tpu.memory_space<vmem>>, %arg3: memref<16x128xf32, #tpu.memory_space<vmem>>, %arg4: memref<1x16x128xf32, #tpu.memory_space<vmem>>) attributes {dimension_semantics = [#tpu.dimension_semantics<parallel>, #tpu.dimension_semantics<arbitrary>], iteration_bounds = array<i64: 1, 1>, scalar_prefetch = 0 : i64, scratch_operands = 0 : i64, tpu.core_type = #tpu.core_type<tc>, window_params = [{transform_indices = @transform_0, window_bounds = array<i64: 16, 128>}, {transform_indices = @transform_1, window_bounds = array<i64: 16, 128>}, {transform_indices = @transform_2, window_bounds = array<i64: 1, 16, 128>}]} {
    %c0_i32 = arith.constant 0 : i32
    %0 = arith.cmpi eq, %arg1, %c0_i32 : i32
    %1 = arith.extui %0 : i1 to i32
    %c0_i32_0 = arith.constant 0 : i32
    %2 = arith.cmpi ne, %1, %c0_i32_0 : i32
    scf.if %2 {
      %cst_10 = arith.constant 0.000000e+00 : f32
      %23 = vector.broadcast %cst_10 : f32 to vector<1x16x128xf32>
      %c0_11 = arith.constant 0 : index
      %c0_12 = arith.constant 0 : index
      %c0_13 = arith.constant 0 : index
      %24 = vector.load %arg4[%c0_11, %c0_12, %c0_13] : memref<1x16x128xf32, #tpu.memory_space<vmem>>, vector<1x16x128xf32>
      tpu.vector_store %arg4[%c0_11, %c0_12, %c0_13], %23 {strides = array<i32>} : memref<1x16x128xf32, #tpu.memory_space<vmem>>, vector<1x16x128xf32>,
    } else {
    }
    %c1_i32 = arith.constant 1 : i32
    %3 = arith.muli %arg0, %c1_i32 : i32
    %4 = arith.addi %3, %arg1 : i32
    %c0_i32_1 = arith.constant 0 : i32
    %5 = arith.minsi %4, %c0_i32_1 : i32
    %c0 = arith.constant 0 : index
    %c0_2 = arith.constant 0 : index
    %6 = vector.load %arg2[%c0, %c0_2] : memref<16x128xf32, #tpu.memory_space<vmem>>, vector<16x128xf32>
    %c0_3 = arith.constant 0 : index
    %c0_4 = arith.constant 0 : index
    %7 = vector.load %arg3[%c0_3, %c0_4] : memref<16x128xf32, #tpu.memory_space<vmem>>, vector<16x128xf32>
    %8 = arith.subf %6, %7 : vector<16x128xf32>
    %9 = arith.mulf %8, %8 : vector<16x128xf32>
    %cst = arith.constant 9.99999997E-7 : f32
    %10 = vector.broadcast %cst : f32 to vector<16x128xf32>
    %11 = arith.addf %9, %10 : vector<16x128xf32>
    %12 = math.sqrt %11 : vector<16x128xf32>
    %c16_i32 = arith.constant 16 : i32
    %13 = arith.muli %5, %c16_i32 : i32
    %c16_i32_5 = arith.constant 16 : i32
    %14 = arith.addi %13, %c16_i32_5 : i32
    %c16_i32_6 = arith.constant 16 : i32
    %15 = arith.cmpi sgt, %14, %c16_i32_6 : i32
    %c1_i32_7 = arith.constant 1 : i32
    %16 = arith.cmpi sge, %4, %c1_i32_7 : i32
    %17 = arith.ori %15, %16 : i1
    %true = arith.constant true
    %18 = arith.xori %17, %true : i1
    %19 = arith.extui %18 : i1 to i32
    %c0_i32_8 = arith.constant 0 : i32
    %20 = arith.cmpi ne, %19, %c0_i32_8 : i32
    scf.if %20 {
      %c0_10 = arith.constant 0 : index
      %c0_11 = arith.constant 0 : index
      %c0_12 = arith.constant 0 : index
      %23 = vector.load %arg4[%c0_10, %c0_11, %c0_12] : memref<1x16x128xf32, #tpu.memory_space<vmem>>, vector<1x16x128xf32>
      %24 = vector.shape_cast %23 : vector<1x16x128xf32> to vector<16x128xf32>
      %25 = vector.shape_cast %12 : vector<16x128xf32> to vector<1x16x128xf32>
      %cst_13 = arith.constant dense<0.000000e+00> : vector<16x128xf32>
      %26 = vector.multi_reduction <add>, %25, %cst_13 [0] : vector<1x16x128xf32> to vector<16x128xf32>
      %27 = arith.addf %24, %26 : vector<16x128xf32>
      %c0_14 = arith.constant 0 : index
      %c0_15 = arith.constant 0 : index
      %c0_16 = arith.constant 0 : index
      %28 = vector.load %arg4[%c0_14, %c0_15, %c0_16] : memref<1x16x128xf32, #tpu.memory_space<vmem>>, vector<1x16x128xf32>
      %29 = vector.shape_cast %28 : vector<1x16x128xf32> to vector<16x128xf32>
      %30 = vector.shape_cast %27 : vector<16x128xf32> to vector<1x16x128xf32>
      tpu.vector_store %arg4[%c0_14, %c0_15, %c0_16], %30 {strides = array<i32>} : memref<1x16x128xf32, #tpu.memory_space<vmem>>, vector<1x16x128xf32>,
    } else {
    }
    %21 = arith.extui %17 : i1 to i32
    %c0_i32_9 = arith.constant 0 : i32
    %22 = arith.cmpi ne, %21, %c0_i32_9 : i32
    scf.if %22 {
      %23 = tpu.iota {dimensions = array<i32: 0>} : vector<16x128xi32>
      %24 = vector.broadcast %13 : i32 to vector<16x128xi32>
      %25 = arith.addi %24, %23 : vector<16x128xi32>
      %c16_i32_10 = arith.constant 16 : i32
      %26 = vector.broadcast %c16_i32_10 : i32 to vector<16x128xi32>
      %27 = arith.cmpi slt, %25, %26 : vector<16x128xi32>
      %c1_i32_11 = arith.constant 1 : i32
      %28 = arith.cmpi slt, %4, %c1_i32_11 : i32
      %29 = vector.broadcast %28 : i1 to vector<16x128xi1>
      %30 = arith.andi %27, %29 : vector<16x128xi1>
      %cst_12 = arith.constant 0.000000e+00 : f32
      %31 = vector.broadcast %cst_12 : f32 to vector<16x128xf32>
      %32 = arith.select %30, %12, %31 : vector<16x128xi1>, vector<16x128xf32>
      %c0_13 = arith.constant 0 : index
      %c0_14 = arith.constant 0 : index
      %c0_15 = arith.constant 0 : index
      %33 = vector.load %arg4[%c0_13, %c0_14, %c0_15] : memref<1x16x128xf32, #tpu.memory_space<vmem>>, vector<1x16x128xf32>
      %34 = vector.shape_cast %33 : vector<1x16x128xf32> to vector<16x128xf32>
      %35 = vector.shape_cast %32 : vector<16x128xf32> to vector<1x16x128xf32>
      %cst_16 = arith.constant dense<0.000000e+00> : vector<16x128xf32>
      %36 = vector.multi_reduction <add>, %35, %cst_16 [0] : vector<1x16x128xf32> to vector<16x128xf32>
      %37 = arith.addf %34, %36 : vector<16x128xf32>
      %c0_17 = arith.constant 0 : index
      %c0_18 = arith.constant 0 : index
      %c0_19 = arith.constant 0 : index
      %38 = vector.load %arg4[%c0_17, %c0_18, %c0_19] : memref<1x16x128xf32, #tpu.memory_space<vmem>>, vector<1x16x128xf32>
      %39 = vector.shape_cast %38 : vector<1x16x128xf32> to vector<16x128xf32>
      %40 = vector.shape_cast %37 : vector<16x128xf32> to vector<1x16x128xf32>
      tpu.vector_store %arg4[%c0_17, %c0_18, %c0_19], %40 {strides = array<i32>} : memref<1x16x128xf32, #tpu.memory_space<vmem>>, vector<1x16x128xf32>,
    } else {
    }
    return
  }
  func.func @transform_0(%arg0: i32, %arg1: i32) -> (i32, i32) {
    %c1_i32 = arith.constant 1 : i32
    %0 = arith.muli %arg0, %c1_i32 : i32
    %1 = arith.addi %0, %arg1 : i32
    %c0_i32 = arith.constant 0 : i32
    %2 = arith.minsi %1, %c0_i32 : i32
    %c0_i32_0 = arith.constant 0 : i32
    %c0_i32_1 = arith.constant 0 : i32
    return %2, %c0_i32_0 : i32, i32
  }
  func.func @transform_1(%arg0: i32, %arg1: i32) -> (i32, i32) {
    %c1_i32 = arith.constant 1 : i32
    %0 = arith.muli %arg0, %c1_i32 : i32
    %1 = arith.addi %0, %arg1 : i32
    %c0_i32 = arith.constant 0 : i32
    %2 = arith.minsi %1, %c0_i32 : i32
    %c0_i32_0 = arith.constant 0 : i32
    %c0_i32_1 = arith.constant 0 : i32
    return %2, %c0_i32_0 : i32, i32
  }
  func.func @transform_2(%arg0: i32, %arg1: i32) -> (i32, i32, i32) {
    %c0_i32 = arith.constant 0 : i32
    %c0_i32_0 = arith.constant 0 : i32
    %c0_i32_1 = arith.constant 0 : i32
    return %arg0, %c0_i32, %c0_i32_0 : i32, i32, i32
  }
}

</mosaic_0001>

<bundles_post_ra>
// kernel: charbonnier_loss.1
= control target key start
LH: loop header
LB: loop body
LE: loop exit
PB: predicated region body
PF: predicated region fallthrough
CT: control target
= control target key end

     0   :  { %s205_s0 = inlined_call_operand.vmem [shape: f32[16,128], index: 0, kind: input, shape index: {}]   ;;  %s206_s1 = inlined_call_operand.vmem [shape: f32[16,128], index: 1, kind: input, shape index: {}]   ;;  %s207_s2 = inlined_call_operand.vmem [shape: f32[1,16,128], index: 2, kind: output, shape index: {}]  }
   0x1   :  { %v84_v0 = vld [vmem:[%s205_s0] sm:$0xff]  ;;  %v85_v2 = vld [vmem:[%s205_s0 + $0x8] sm:$0xff] }
   0x2   :  { %v86_v1 = vld [vmem:[%s206_s1] sm:$0xff]  ;;  %v87_v4 = vld [vmem:[%s206_s1 + $0x8] sm:$0xff] }
   0x3   :  { %v88_v3 = vsub.f32 %v84_v0, %v86_v1  ;;  %v89_v5 = vsub.f32 %v85_v2, %v87_v4 }
   0x5   :  { %v90_v6 = vmul.f32 %v88_v3, %v88_v3  ;;  %v91_v7 = vmul.f32 %v89_v5, %v89_v5 }
   0x7   :  { %v92_v8 = vadd.f32 1e-06, %v90_v6  ;;  %v93_v9 = vadd.f32 1e-06, %v91_v7 }
   0x9   :  { %168 = vrsqrt.f32 %v92_v8  ;;  %vm96_vm0 = vcmp.eq.f32.partialorder %v92_v8, inf  ;;  %v99_v11 = vand.u32 2147483648, %v92_v8  ;;  %vm98_vm1 = vcmp.eq.f32.partialorder %v92_v8, 0.0 }
   0xa   :  { %170 = vrsqrt.f32 %v93_v9  ;;  %vm103_vm2 = vcmp.eq.f32.partialorder %v93_v9, inf  ;;  %v106_v14 = vand.u32 2147483648, %v93_v9  ;;  %vm105_vm3 = vcmp.eq.f32.partialorder %v93_v9, 0.0 }
  0x16   :  { %v169_v10 = vpop.eup %168 }
  0x17   :  { %v171_v12 = vpop.eup %170  ;;  %v95_v13 = vmul.f32 %v169_v10, %v92_v8 }
  0x18   :  { %v102_v15 = vmul.f32 %v171_v12, %v93_v9 }
  0x19   :  { %v97_v16 = vsel %vm96_vm0, %v92_v8, %v95_v13 }
  0x1a   :  { %v100_v17 = vsel %vm98_vm1, %v99_v11, %v97_v16  ;;  %v104_v18 = vsel %vm103_vm2, %v93_v9, %v102_v15 }
  0x1b   :  { %v107_v19 = vsel %vm105_vm3, %v106_v14, %v104_v18  ;;  %149 = vst [vmem:[%s207_s2] sm:$0xff] %v100_v17 }
  0x1c   :  { %150 = vst [vmem:[%s207_s2 + $0x8] sm:$0xff] %v107_v19 }

</bundles_post_ra>
